<compile_context>
chip_gen: v7x
topology: tpu7x:2x2x1
jax: 0.10.0
libtpu: 0.0.40
codegen_flags: <defaults>
</compile_context>

<pallas_src>
import jax
import jax.numpy as jnp
from jax.experimental import pallas as pl
from jax.experimental.pallas import tpu as pltpu

SUBLANE = 8  # f32 sublane count (second-to-last dim granularity)


def _round_up(n, m):
    return ((n + m - 1) // m) * m


def simple_nn_kernel(z_ref, w1_ref, b1_ref, w2_ref, b2_ref, w3_ref, b3_ref, out_ref):
    # Layer 1: Linear -> ReLU (MXU matmul, f32 accumulation; bias/ReLU in f32)
    h1 = jnp.dot(z_ref[...], w1_ref[...], preferred_element_type=jnp.float32)
    h1 = jnp.maximum(h1 + b1_ref[...], 0.0)
    # Dropout: identity in eval mode.
    # TODO(synk): training-mode dropout (pltpu.prng_seed + pltpu.prng_random_bits mask)
    # is not implemented.

    # Layer 2: Linear -> ReLU
    h2 = jnp.dot(h1.astype(w2_ref.dtype), w2_ref[...],
                 preferred_element_type=jnp.float32)
    h2 = jnp.maximum(h2 + b2_ref[...], 0.0)

    # Output projection
    y = jnp.dot(h2.astype(w3_ref.dtype), w3_ref[...],
                preferred_element_type=jnp.float32)
    out_ref[...] = (y + b3_ref[...]).astype(out_ref.dtype)


def simple_nn_forward(z, params, *, compute_dtype=jnp.float32, tm=1024):
    """z: [B, n_context] float32. Returns {'theta': [B, n_out, 1]} (f32).

    compute_dtype: dtype of the MXU operands (jnp.bfloat16 is a good choice on
      v6e/v7x for large batches; accumulation/bias/ReLU stay f32 regardless).
    tm: batch rows per grid step.  1024 keeps per-step DMA + fixed overhead
      amortized while staying far under the VMEM budget (z tile + output tile
      + resident weights + intermediates << 2 MiB per step).
    """
    w1, b1, w2, b2, w3, b3 = (
        params["w1"], params["b1"], params["w2"],
        params["b2"], params["w3"], params["b3"],
    )
    B, C = z.shape
    H = w1.shape[1]
    N = w3.shape[1]

    # Batch tiling: pad B (rows only) to a multiple of the tile so there are
    # no partial blocks.  Feature dims stay unpadded.
    Bp = _round_up(B, SUBLANE)
    tm = min(tm, Bp)
    Bp = _round_up(Bp, tm)
    grid = (Bp // tm,)

    z_in = z.astype(compute_dtype)
    if Bp != B:
        z_in = jnp.pad(z_in, ((0, Bp - B), (0, 0)))

    w1_c = w1.astype(compute_dtype)
    w2_c = w2.astype(compute_dtype)
    w3_c = w3.astype(compute_dtype)
    b1_c = b1.reshape(1, H).astype(jnp.float32)   # biases / ReLU stay f32
    b2_c = b2.reshape(1, H).astype(jnp.float32)
    b3_c = b3.reshape(1, N).astype(jnp.float32)

    itemsize = jnp.dtype(compute_dtype).itemsize
    flops = 2 * Bp * (C * H + H * H + H * N)
    bytes_accessed = (
        z_in.size * itemsize
        + (w1_c.size + w2_c.size + w3_c.size) * itemsize
        + (b1_c.size + b2_c.size + b3_c.size) * 4
        + Bp * N * 4
    )

    # Weights/biases: constant index_map -> fetched once, VMEM-resident.
    resident = lambda a: pl.BlockSpec(a.shape, lambda i: (0, 0))

    y_full = pl.pallas_call(
        simple_nn_kernel,
        out_shape=jax.ShapeDtypeStruct((Bp, N), jnp.float32),
        grid_spec=pl.GridSpec(
            grid=grid,
            in_specs=[
                pl.BlockSpec((tm, C), lambda i: (i, 0)),   # z: batch-tiled, pipelined
                resident(w1_c), resident(b1_c),
                resident(w2_c), resident(b2_c),
                resident(w3_c), resident(b3_c),
            ],
            out_specs=pl.BlockSpec((tm, N), lambda i: (i, 0)),
        ),
        compiler_params=pltpu.CompilerParams(
            dimension_semantics=("parallel",),   # megacore sharding on v7x
        ),
        cost_estimate=pl.CostEstimate(
            flops=flops, transcendentals=0, bytes_accessed=bytes_accessed),
    )(z_in, w1_c, b1_c, w2_c, b2_c, w3_c, b3_c)

    y = y_full[:B] if Bp != B else y_full
    # .unsqueeze(-1) equivalent (pure reshape glue).
    return {"theta": y[..., None]}


def init_params(key, n_context, hidden_size, n_out):
    """Deterministic init mimicking nn.Linear's uniform(-1/sqrt(fan_in), +1/sqrt(fan_in)).
    Weights stored as [in_features, out_features]."""
    ks = jax.random.split(key, 6)

    def linear(kw, kb, fan_in, fan_out):
        bound = 1.0 / jnp.sqrt(jnp.float32(fan_in))
        w = jax.random.uniform(kw, (fan_in, fan_out), jnp.float32, -bound, bound)
        b = jax.random.uniform(kb, (1, fan_out), jnp.float32, -bound, bound)
        return w, b

    w1, b1 = linear(ks[0], ks[1], n_context, hidden_size)
    w2, b2 = linear(ks[2], ks[3], hidden_size, hidden_size)
    w3, b3 = linear(ks[4], ks[5], hidden_size, n_out)
    return {"w1": w1, "b1": b1, "w2": w2, "b2": b2, "w3": w3, "b3": b3}


if __name__ == "__main__":
    batch, n_context, hidden_size, n_out = 8, 16, 32, 4

    key = jax.random.PRNGKey(0)
    k_in, k_params = jax.random.split(key)

    z = jax.random.normal(k_in, (batch, n_context), dtype=jnp.float32)
    params = init_params(k_params, n_context, hidden_size, n_out)

    # f32 operands at this tiny size so the 1e-5 sanity tolerance holds;
    # pass compute_dtype=jnp.bfloat16 for large, MXU-bound problems (v6e/v7x).
    out = simple_nn_forward(z, params, compute_dtype=jnp.float32)
    theta = jax.block_until_ready(out["theta"])

    # Sanity check vs. plain-JAX reference (inference mode, dropout = identity).
    h = jnp.maximum(z @ params["w1"] + params["b1"], 0.0)
    h = jnp.maximum(h @ params["w2"] + params["b2"], 0.0)
    ref = (h @ params["w3"] + params["b3"])[..., None]
    assert theta.shape == (batch, n_out, 1)
    assert jnp.allclose(theta, ref, atol=1e-5, rtol=1e-5)

    print("KERNEL_OK")
</pallas_src>

<mosaic_0001>
module attributes {stable_mosaic.version = 11 : i64} {
  func.func @simple_nn_kernel(%arg0: i32, %arg1: memref<8x16xf32, #tpu.memory_space<vmem>>, %arg2: memref<16x32xf32, #tpu.memory_space<vmem>>, %arg3: memref<1x32xf32, #tpu.memory_space<vmem>>, %arg4: memref<32x32xf32, #tpu.memory_space<vmem>>, %arg5: memref<1x32xf32, #tpu.memory_space<vmem>>, %arg6: memref<32x4xf32, #tpu.memory_space<vmem>>, %arg7: memref<1x4xf32, #tpu.memory_space<vmem>>, %arg8: memref<8x4xf32, #tpu.memory_space<vmem>>) attributes {dimension_semantics = [#tpu.dimension_semantics<parallel>], iteration_bounds = array<i64: 1>, scalar_prefetch = 0 : i64, scratch_operands = 0 : i64, tpu.core_type = #tpu.core_type<tc>, window_params = [{transform_indices = @transform_0, window_bounds = array<i64: 8, 16>}, {pipeline_mode = #tpu.pipeline_mode<synchronous>, transform_indices = @transform_1, window_bounds = array<i64: 16, 32>}, {pipeline_mode = #tpu.pipeline_mode<synchronous>, transform_indices = @transform_2, window_bounds = array<i64: 1, 32>}, {pipeline_mode = #tpu.pipeline_mode<synchronous>, transform_indices = @transform_3, window_bounds = array<i64: 32, 32>}, {pipeline_mode = #tpu.pipeline_mode<synchronous>, transform_indices = @transform_4, window_bounds = array<i64: 1, 32>}, {pipeline_mode = #tpu.pipeline_mode<synchronous>, transform_indices = @transform_5, window_bounds = array<i64: 32, 4>}, {pipeline_mode = #tpu.pipeline_mode<synchronous>, transform_indices = @transform_6, window_bounds = array<i64: 1, 4>}, {transform_indices = @transform_7, window_bounds = array<i64: 8, 4>}]} {
    %c0 = arith.constant 0 : index
    %c0_0 = arith.constant 0 : index
    %0 = vector.load %arg1[%c0, %c0_0] : memref<8x16xf32, #tpu.memory_space<vmem>>, vector<8x16xf32>
    %c0_1 = arith.constant 0 : index
    %c0_2 = arith.constant 0 : index
    %1 = vector.load %arg2[%c0_1, %c0_2] : memref<16x32xf32, #tpu.memory_space<vmem>>, vector<16x32xf32>
    %cst = arith.constant dense<0.000000e+00> : vector<8x32xf32>
    %2 = tpu.matmul %0, %1, %cst {dimension_numbers = #tpu.dot_dimension_numbers<[1], [0], [0], [1], [0, 0, 1, 1], [], []>} : vector<8x16xf32>, vector<16x32xf32>, vector<8x32xf32> -> vector<8x32xf32>
    %c0_3 = arith.constant 0 : index
    %c0_4 = arith.constant 0 : index
    %3 = vector.load %arg3[%c0_3, %c0_4] : memref<1x32xf32, #tpu.memory_space<vmem>>, vector<1x32xf32>
    %4 = vector.broadcast %3 : vector<1x32xf32> to vector<8x32xf32>
    %5 = arith.addf %2, %4 : vector<8x32xf32>
    %cst_5 = arith.constant 0.000000e+00 : f32
    %6 = vector.broadcast %cst_5 : f32 to vector<8x32xf32>
    %7 = arith.maximumf %5, %6 : vector<8x32xf32>
    %c0_6 = arith.constant 0 : index
    %c0_7 = arith.constant 0 : index
    %8 = vector.load %arg4[%c0_6, %c0_7] : memref<32x32xf32, #tpu.memory_space<vmem>>, vector<32x32xf32>
    %cst_8 = arith.constant dense<0.000000e+00> : vector<8x32xf32>
    %9 = tpu.matmul %7, %8, %cst_8 {dimension_numbers = #tpu.dot_dimension_numbers<[1], [0], [0], [1], [0, 0, 1, 1], [], []>} : vector<8x32xf32>, vector<32x32xf32>, vector<8x32xf32> -> vector<8x32xf32>
    %c0_9 = arith.constant 0 : index
    %c0_10 = arith.constant 0 : index
    %10 = vector.load %arg5[%c0_9, %c0_10] : memref<1x32xf32, #tpu.memory_space<vmem>>, vector<1x32xf32>
    %11 = vector.broadcast %10 : vector<1x32xf32> to vector<8x32xf32>
    %12 = arith.addf %9, %11 : vector<8x32xf32>
    %cst_11 = arith.constant 0.000000e+00 : f32
    %13 = vector.broadcast %cst_11 : f32 to vector<8x32xf32>
    %14 = arith.maximumf %12, %13 : vector<8x32xf32>
    %c0_12 = arith.constant 0 : index
    %c0_13 = arith.constant 0 : index
    %15 = vector.load %arg6[%c0_12, %c0_13] : memref<32x4xf32, #tpu.memory_space<vmem>>, vector<32x4xf32>
    %cst_14 = arith.constant dense<0.000000e+00> : vector<8x4xf32>
    %16 = tpu.matmul %14, %15, %cst_14 {dimension_numbers = #tpu.dot_dimension_numbers<[1], [0], [0], [1], [0, 0, 1, 1], [], []>} : vector<8x32xf32>, vector<32x4xf32>, vector<8x4xf32> -> vector<8x4xf32>
    %c0_15 = arith.constant 0 : index
    %c0_16 = arith.constant 0 : index
    %17 = vector.load %arg7[%c0_15, %c0_16] : memref<1x4xf32, #tpu.memory_space<vmem>>, vector<1x4xf32>
    %18 = vector.broadcast %17 : vector<1x4xf32> to vector<8x4xf32>
    %19 = arith.addf %16, %18 : vector<8x4xf32>
    %c0_17 = arith.constant 0 : index
    %c0_18 = arith.constant 0 : index
    %20 = vector.load %arg8[%c0_17, %c0_18] : memref<8x4xf32, #tpu.memory_space<vmem>>, vector<8x4xf32>
    tpu.vector_store %arg8[%c0_17, %c0_18], %19 {strides = array<i32>} : memref<8x4xf32, #tpu.memory_space<vmem>>, vector<8x4xf32>,
    return
  }
  func.func @transform_0(%arg0: i32) -> (i32, i32) {
    %c0_i32 = arith.constant 0 : i32
    %c0_i32_0 = arith.constant 0 : i32
    return %arg0, %c0_i32 : i32, i32
  }
  func.func @transform_1(%arg0: i32) -> (i32, i32) {
    %c0_i32 = arith.constant 0 : i32
    %c0_i32_0 = arith.constant 0 : i32
    %c0_i32_1 = arith.constant 0 : i32
    return %c0_i32, %c0_i32_0 : i32, i32
  }
  func.func @transform_2(%arg0: i32) -> (i32, i32) {
    %c0_i32 = arith.constant 0 : i32
    %c0_i32_0 = arith.constant 0 : i32
    %c0_i32_1 = arith.constant 0 : i32
    return %c0_i32, %c0_i32_0 : i32, i32
  }
  func.func @transform_3(%arg0: i32) -> (i32, i32) {
    %c0_i32 = arith.constant 0 : i32
    %c0_i32_0 = arith.constant 0 : i32
    %c0_i32_1 = arith.constant 0 : i32
    return %c0_i32, %c0_i32_0 : i32, i32
  }
  func.func @transform_4(%arg0: i32) -> (i32, i32) {
    %c0_i32 = arith.constant 0 : i32
    %c0_i32_0 = arith.constant 0 : i32
    %c0_i32_1 = arith.constant 0 : i32
    return %c0_i32, %c0_i32_0 : i32, i32
  }
  func.func @transform_5(%arg0: i32) -> (i32, i32) {
    %c0_i32 = arith.constant 0 : i32
    %c0_i32_0 = arith.constant 0 : i32
    %c0_i32_1 = arith.constant 0 : i32
    return %c0_i32, %c0_i32_0 : i32, i32
  }
  func.func @transform_6(%arg0: i32) -> (i32, i32) {
    %c0_i32 = arith.constant 0 : i32
    %c0_i32_0 = arith.constant 0 : i32
    %c0_i32_1 = arith.constant 0 : i32
    return %c0_i32, %c0_i32_0 : i32, i32
  }
  func.func @transform_7(%arg0: i32) -> (i32, i32) {
    %c0_i32 = arith.constant 0 : i32
    %c0_i32_0 = arith.constant 0 : i32
    return %arg0, %c0_i32 : i32, i32
  }
}

</mosaic_0001>

<bundles_post_ra>
// kernel: tpu_custom_call.1
= control target key start
LH: loop header
LB: loop body
LE: loop exit
PB: predicated region body
PF: predicated region fallthrough
CT: control target
= control target key end

     0   :  { %12 = vsyncpa [#allocation3], 0  ;;  %s395_s24 = smov [#allocation2]   ;;  %s495_s0 = inlined_call_operand.vmem [shape: f32[8,16], index: 0, kind: input, shape index: {}]   ;;  %s496_s1 = inlined_call_operand.hbm [shape: f32[16,32], index: 1, kind: input, shape index: {}]   ;;  %s497_s2 = inlined_call_operand.vmem [shape: f32[1,32], index: 2, kind: input, shape index: {}]   ;;  %s498_s3 = inlined_call_operand.vmem [shape: f32[32,32], index: 3, kind: input, shape index: {}]   ;;  %s499_s4 = inlined_call_operand.vmem [shape: f32[1,32], index: 4, kind: input, shape index: {}]   ;;  %s500_s5 = inlined_call_operand.vmem [shape: f32[32,4], index: 5, kind: input, shape index: {}]   ;;  %s501_s6 = inlined_call_operand.vmem [shape: f32[1,4], index: 6, kind: input, shape index: {}]   ;;  %s502_s7 = inlined_call_operand.vmem [shape: f32[8,4], index: 7, kind: output, shape index: {}]  }
   0x1   :  { %s20_s25 = sshll.u32 %s395_s24, 4  ;;  %s371_s28 = scalar_lea.hbm %s496_s1, 256  ;;  %s21_s25 = int_to_ptr.vmem [resolvable:$true] %s20_s25 }
   0x2   :  { %p372_p0 = scmp.ne.s32.totalorder %s496_s1, %s371_s28  ;;  %p375_p1 = scmp.lt.u32.totalorder %s371_s28, %s496_s1 }
   0x4   :  { %p377_p2 = pnand %p375_p1, %p372_p0 }
   0x6   :  { %380 = shalt.err (!%p377_p2)
}
   0x7   :  { %s381_s10 = scalar_lea.vmem %s21_s25, 256  ;;  %p386_p4 = scmp.lt.s32.totalorder %s21_s25, %s21_s25 }
   0x8   :  { %p382_p3 = scmp.ne.s32.totalorder %s21_s25, %s381_s10  ;;  %p387_p5 = scmp.lt.s32.totalorder %s381_s10, %s381_s10 }
   0xa   :  { %p388_p6 = por %p387_p5, %p386_p4 }
   0xc   :  { %p389_p7 = pnand %p388_p6, %p382_p3 }
   0xe   :  { %392 = shalt.err (!%p389_p7)
}
   0xf   :  { %s396_s11 = smov 128   ;;  %s397_s12 = smov 8  }
  0x10   :  { %26 = dma.hbm_to_vmem [thread:$0]  %s496_s1, 256, %s21_s25, [#allocation3], %s396_s11, %s396_s11, %s397_s12  }
  0x11   :  { %393 = dma.done.wait [#allocation3], 256  }
  0x12   :  { %394 = vsyncadd [#allocation3], 4294967040  ;;  %v398_v0 = vmov 0.0|0.0   ;;  %vm399_vm0 = vmmov 0   ;;  %v400_v1 = vmov 0.0   ;;  %v41_v2 = vld [vmem:[#allocation2] sm:$0xff] }
  0x13   :  { %350 = vmatprep.subr.bf16.mxu0 %v398_v0  ;;  %325 = vmatprep.mubr.msk.f32.mxu0 %vm399_vm0, %v400_v1  ;;  %v42_v3 = vld [vmem:[#allocation2 + $0x8] sm:$0xff]  ;;  %v125_v5 = vld [vmem:[%s498_s3] sm:$0xff]  ;;  %vm50_vm1 = vcmask 130048   ;;  %v127_v9 = vld [vmem:[%s498_s3 + $0x10] sm:$0xff]  ;;  %vm136_vm2 = vcmask 261120   ;;  %vm295_vm3 = vcmask 31744  }
  0x14   :  { %353 = vmatprep.subr.bf16.mxu1 %v398_v0  ;;  %336 = vmatprep.mubr.msk.f32.mxu1 %vm399_vm0, %v400_v1  ;;  %v351_v4 = vpack.c.bf16 %v42_v3, %v41_v2  ;;  %v126_v6 = vld [vmem:[%s498_s3 + $0x8] sm:$0xff]  ;;  %v40_v8 = vld [vmem:[%s495_s0] sm:$0xff]  ;;  %v128_v10 = vld [vmem:[%s498_s3 + $0x18] sm:$0xff] }
  0x15   :  { %v354_v7 = vpack.c.bf16 %v126_v6, %v125_v5  ;;  %v357_v11 = vpack.c.bf16 %v128_v10, %v127_v9  ;;  %v211_v12 = vld [vmem:[%s500_s5] sm:$0xff]  ;;  %v212_v13 = vld [vmem:[%s500_s5 + $0x8] sm:$0xff]  ;;  %v213_v20 = vld [vmem:[%s500_s5 + $0x10] sm:$0xff] }
  0x16   :  { %352 = vmatpush3.bf16.msra.mxu0 %v351_v4  ;;  %v360_v14 = vpack.c.bf16 %v212_v13, %v211_v12  ;;  %v302_v15 = vld [vmem:[%s497_s2] ss:$0 sm:$0xff]  ;;  %v214_v21 = vld [vmem:[%s500_s5 + $0x18] sm:$0xff] }
  0x17   :  { %355 = vmatpush3.bf16.msra.mxu1 %v354_v7  ;;  %359 = vmatprep.subr.bf16.mxu0 %v398_v0  ;;  %v363_v22 = vpack.c.bf16 %v214_v21, %v213_v20  ;;  %v304_v23 = vld [vmem:[%s499_s4] ss:$0 sm:$0xff] }
  0x18   :  { %356 = vmatprep.subr.bf16.mxu1 %v398_v0  ;;  %v306_v28 = vld [vmem:[%s501_s6] ss:$0 sm:$0xff] }
  0x19   :  { %326 = vmatmul.mubr.msk.f32.vlgmr.msra.gmra.mrb[0].mxu0 %vm50_vm1, %v40_v8 }
  0x1a   :  { %347 = vmatprep.mubr.msk.f32.mxu0 %vm399_vm0, %v400_v1  ;;  %361 = vmatpush3.bf16.msra.mxu0 %v360_v14 }
  0x1b   :  { %358 = vmatpush3.bf16.msra.mxu1 %v357_v11  ;;  %362 = vmatprep.subr.bf16.mxu0 %v398_v0 }
  0x1e   :  { %364 = vmatpush3.bf16.msra.mxu0 %v363_v22 }
  0xec   :  { %v120_v16 = vpop.f32.mrb[0].mxu0 }
  0xed   :  { %v121_v17 = vadd.f32 %v302_v15, %v120_v16  ;;  %v327_v18 = vpop.f32.mrb[1].mxu0 }
  0xef   :  { %v124_v19 = vmax.f32 %v121_v17, 0.0 }
  0xf1   :  { %337 = vmatmul.mubr.msk.f32.vlgmr.msra.gmra.mrb[0].mxu1 %vm136_vm2, %v124_v19 }
 0x1c4   :  { %v206_v24 = vpop.f32.mrb[0].mxu1 }
 0x1c5   :  { %v207_v25 = vadd.f32 %v304_v23, %v206_v24  ;;  %v338_v26 = vpop.f32.mrb[1].mxu1 }
 0x1c7   :  { %v210_v27 = vmax.f32 %v207_v25, 0.0 }
 0x1c9   :  { %348 = vmatmul.mubr.msk.f32.vlgmr.msra.gmra.mrb[2].mxu0 %vm136_vm2, %v210_v27 }
 0x29c   :  { %v291_v29 = vpop.f32.mrb[2].mxu0 }
 0x29d   :  { %v292_v30 = vadd.f32 %v306_v28, %v291_v29  ;;  %v349_v31 = vpop.f32.mrb[3].mxu0 }
 0x29f   :  { %296 = vst.msk [vmem:[%s502_s7] sm:$0xff] %vm295_vm3, %v292_v30 }
 0x2a0   :  { %301 = vsyncpa [#allocation3], 1 }

</bundles_post_ra>
